<compile_context>
chip_gen: v5e
topology: v5e:2x2
jax: 0.10.0
libtpu: 0.0.40
codegen_flags: <defaults>
</compile_context>

<pallas_src>
import jax
import jax.numpy as jnp
import numpy as np
from jax import lax
from jax.experimental import pallas as pl
from jax.experimental.pallas import tpu as pltpu

NUM_CORES = 2  # leading "parallel" grid axis; v7x has 2 TCs, harmless on 1-TC parts


def make_penalty_kernel(rows1, rows2, block_rows, chunk_rows, lanes, bpc):
    """rows1/rows2: valid row counts of each input slab (rows beyond are masked)."""
    n_chunks = block_rows // chunk_rows

    def kernel(x1_ref, x2_ref, o_sum_ref, o_sq_ref, acc_sum_ref, acc_sq_ref):
        c = pl.program_id(0)          # core-split axis ("parallel")
        i = pl.program_id(1)          # reduction axis ("arbitrary")

        @pl.when(i == 0)
        def _init():
            acc_sum_ref[...] = jnp.zeros_like(acc_sum_ref)
            acc_sq_ref[...] = jnp.zeros_like(acc_sq_ref)

        # First global row covered by this (unclamped) block; blocks past the
        # end of an input are fully masked below (their DMA index is clamped).
        row0 = (c * bpc + i) * block_rows

        # Hoisted iota (constant per grid step): local row index within a chunk.
        local = lax.broadcasted_iota(jnp.int32, (chunk_rows, lanes), 0)

        def body(j, carry):
            r0 = pl.multiple_of(j * chunk_rows, chunk_rows)
            g = local + (row0 + r0)                       # global row index
            a = jnp.where(g < rows1, x1_ref[pl.ds(r0, chunk_rows), :], 0.0)
            b = jnp.where(g < rows2, x2_ref[pl.ds(r0, chunk_rows), :], 0.0)
            # Fold the chunk into the small (8, lanes) accumulators: the
            # reshape splits whole vreg rows, sum(axis=0) is vreg-wise VALU adds.
            acc_sum_ref[...] += (a + b).reshape(chunk_rows // 8, 8, lanes).sum(axis=0)
            acc_sq_ref[...] += (a * a + b * b).reshape(chunk_rows // 8, 8, lanes).sum(axis=0)
            return carry

        lax.fori_loop(0, n_chunks, body, 0)

        @pl.when(i == pl.num_programs(1) - 1)
        def _finalize():
            # Per-core partials, broadcast over a full (1, 8, 128) tile so the
            # store is lane-dense and unmasked; wrapper slices [., 0, 0].
            o_sum_ref[...] = jnp.zeros_like(o_sum_ref) + jnp.sum(acc_sum_ref[...])
            o_sq_ref[...] = jnp.zeros_like(o_sq_ref) + jnp.sum(acc_sq_ref[...])

    return kernel


def penalty_forward(x1: jax.Array, x2: jax.Array, alpha: float,
                    *, max_block_bytes=None) -> jax.Array:
    """Pallas equivalent of Penalty.forward(); returns a scalar (float32)."""
    n_true = x1.shape[0] + x2.shape[0]
    max_len = max(x1.shape[0], x2.shape[0])

    # Lane width: 128 for tiny inputs (single-tile path), 512 otherwise.
    LANES = 512 if max_len >= 4096 else 128

    def to_slab(v):
        v = v.astype(jnp.float32)
        rem = v.shape[0] % LANES
        if rem:
            # Only a tail pad of < LANES elements (zeros add 0 to both sums);
            # when len % LANES == 0 this path is copy-free (reshape only).
            v = jnp.pad(v, (0, LANES - rem))
        return v.reshape(-1, LANES)

    s1 = to_slab(x1)
    s2 = to_slab(x2)
    rows1, rows2 = s1.shape[0], s2.shape[0]

    # --- Generation-aware block sizing -------------------------------------
    try:
        vmem_phys = int(pltpu.get_tpu_info().vmem_capacity_bytes)
    except Exception:
        vmem_phys = 64 * 1024 * 1024          # conservative (v7x-sized)
    if vmem_phys >= 128 * 1024 * 1024:        # v5e / v6e
        per_block_cap, vmem_limit = 8 << 20, 64 << 20
    else:                                     # v7x (or unknown)
        per_block_cap, vmem_limit = 4 << 20, 40 << 20
    if max_block_bytes is not None:
        per_block_cap = min(per_block_cap, int(max_block_bytes))

    br_cap = max(8, (per_block_cap // (LANES * 4) // 8) * 8)
    r_max = max(rows1, rows2)
    BR = min(br_cap, ((r_max + 7) // 8) * 8)
    if BR >= 64:
        BR = (BR // 64) * 64                  # keep divisible by the chunk size
    BR = max(BR, 8)
    CR = min(64, BR)                          # rows processed per inner-loop step

    blocks1 = pl.cdiv(rows1, BR)
    blocks2 = pl.cdiv(rows2, BR)
    nblocks = max(blocks1, blocks2)
    bpc = pl.cdiv(nblocks, NUM_CORES)         # row-blocks per core

    kernel = make_penalty_kernel(rows1, rows2, BR, CR, LANES, bpc)

    out_sum, out_sq = pl.pallas_call(
        kernel,
        out_shape=(
            jax.ShapeDtypeStruct((NUM_CORES, 8, 128), jnp.float32),
            jax.ShapeDtypeStruct((NUM_CORES, 8, 128), jnp.float32),
        ),
        grid_spec=pltpu.PrefetchScalarGridSpec(
            num_scalar_prefetch=0,
            grid=(NUM_CORES, bpc),
            in_specs=[
                # Clamp the block index of each input (shorter input may run
                # out of blocks); out-of-range blocks are masked in the kernel.
                pl.BlockSpec(
                    (BR, LANES),
                    lambda c, i, b1=blocks1, b=bpc: (jnp.minimum(c * b + i, b1 - 1), 0)),
                pl.BlockSpec(
                    (BR, LANES),
                    lambda c, i, b2=blocks2, b=bpc: (jnp.minimum(c * b + i, b2 - 1), 0)),
            ],
            out_specs=[
                pl.BlockSpec((1, 8, 128), lambda c, i: (c, 0, 0)),
                pl.BlockSpec((1, 8, 128), lambda c, i: (c, 0, 0)),
            ],
            scratch_shapes=[
                pltpu.VMEM((8, LANES), jnp.float32),   # partial sum(x)
                pltpu.VMEM((8, LANES), jnp.float32),   # partial sum(x^2)
            ],
        ),
        compiler_params=pltpu.CompilerParams(
            dimension_semantics=("parallel", "arbitrary"),
            vmem_limit_bytes=vmem_limit,
        ),
    )(s1, s2)

    # Combine per-core partials and apply the (nonlinear) epilogue in the wrapper.
    s_x = jnp.sum(out_sum[:, 0, 0])
    s_x2 = jnp.sum(out_sq[:, 0, 0])
    # sum((x-1)^2) = sum(x^2) - 2*sum(x) + n
    s_dist = s_x2 - 2.0 * s_x + jnp.float32(n_true)
    return jnp.float32(alpha) * s_dist + (s_x2 - 0.25) ** 2


if __name__ == "__main__":
    _ = jax.random.PRNGKey(0)  # forward() has no runtime inputs; key kept per convention

    # --- Module's default-style instantiation: n = 16 ----------------------
    n = 16
    alpha = 1e-05
    m = n // 2
    x1 = jnp.arange(1, m + 1, dtype=jnp.float32)          # [1..m]
    x2 = jnp.arange(m + 1, n + 1, dtype=jnp.float32)      # [m+1..n]

    out = jax.block_until_ready(penalty_forward(x1, x2, alpha))

    x = np.arange(1, n + 1, dtype=np.float64)
    ref = alpha * np.sum((x - 1.0) ** 2) + (np.sum(x ** 2) - 0.25) ** 2
    assert np.allclose(float(out), ref, rtol=1e-4, atol=1e-3), (float(out), ref)

    # --- Larger case: exercises multi-block streaming, the dual-core grid
    #     axis, index clamping and the masked ragged tail. -------------------
    n_big = 250_000
    m_big = n_big // 2
    y1 = jnp.arange(1, m_big + 1, dtype=jnp.float32)
    y2 = jnp.arange(m_big + 1, n_big + 1, dtype=jnp.float32)
    out_big = jax.block_until_ready(
        penalty_forward(y1, y2, alpha, max_block_bytes=64 * 1024))

    xb = np.arange(1, n_big + 1, dtype=np.float64)
    ref_big = alpha * np.sum((xb - 1.0) ** 2) + (np.sum(xb ** 2) - 0.25) ** 2
    assert np.allclose(float(out_big), ref_big, rtol=1e-3), (float(out_big), ref_big)

    print("KERNEL_OK")
</pallas_src>

<mosaic_0001>
module attributes {stable_mosaic.version = 11 : i64} {
  func.func @kernel(%arg0: i32, %arg1: i32, %arg2: memref<8x128xf32, #tpu.memory_space<vmem>>, %arg3: memref<8x128xf32, #tpu.memory_space<vmem>>, %arg4: memref<1x8x128xf32, #tpu.memory_space<vmem>>, %arg5: memref<1x8x128xf32, #tpu.memory_space<vmem>>, %arg6: memref<8x128xf32, #tpu.memory_space<vmem>>, %arg7: memref<8x128xf32, #tpu.memory_space<vmem>>) attributes {dimension_semantics = [#tpu.dimension_semantics<parallel>, #tpu.dimension_semantics<arbitrary>], iteration_bounds = array<i64: 2, 1>, scalar_prefetch = 0 : i64, scratch_operands = 2 : i64, tpu.core_type = #tpu.core_type<tc>, window_params = [{transform_indices = @transform_0, window_bounds = array<i64: 8, 128>}, {transform_indices = @transform_1, window_bounds = array<i64: 8, 128>}, {transform_indices = @transform_2, window_bounds = array<i64: 1, 8, 128>}, {transform_indices = @transform_3, window_bounds = array<i64: 1, 8, 128>}]} {
    %c0_i32 = arith.constant 0 : i32
    %0 = arith.cmpi eq, %arg1, %c0_i32 : i32
    %1 = arith.extui %0 : i1 to i32
    %c0_i32_0 = arith.constant 0 : i32
    %2 = arith.cmpi ne, %1, %c0_i32_0 : i32
    scf.if %2 {
      %cst_20 = arith.constant 0.000000e+00 : f32
      %41 = vector.broadcast %cst_20 : f32 to vector<8x128xf32>
      %c0_21 = arith.constant 0 : index
      %c0_22 = arith.constant 0 : index
      %42 = vector.load %arg6[%c0_21, %c0_22] : memref<8x128xf32, #tpu.memory_space<vmem>>, vector<8x128xf32>
      tpu.vector_store %arg6[%c0_21, %c0_22], %41 {strides = array<i32>} : memref<8x128xf32, #tpu.memory_space<vmem>>, vector<8x128xf32>,
      %cst_23 = arith.constant 0.000000e+00 : f32
      %43 = vector.broadcast %cst_23 : f32 to vector<8x128xf32>
      %c0_24 = arith.constant 0 : index
      %c0_25 = arith.constant 0 : index
      %44 = vector.load %arg7[%c0_24, %c0_25] : memref<8x128xf32, #tpu.memory_space<vmem>>, vector<8x128xf32>
      tpu.vector_store %arg7[%c0_24, %c0_25], %43 {strides = array<i32>} : memref<8x128xf32, #tpu.memory_space<vmem>>, vector<8x128xf32>,
    } else {
    }
    %c1_i32 = arith.constant 1 : i32
    %3 = arith.muli %arg0, %c1_i32 : i32
    %4 = arith.addi %3, %arg1 : i32
    %c8_i32 = arith.constant 8 : i32
    %5 = arith.muli %4, %c8_i32 : i32
    %6 = tpu.iota {dimensions = array<i32: 0>} : vector<8x128xi32>
    %c0_i32_1 = arith.constant 0 : i32
    %c8_i32_2 = arith.constant 8 : i32
    %7 = arith.muli %c0_i32_1, %c8_i32_2 : i32
    %8 = tpu.assume_multiple %7, 8 : i32
    %9 = arith.addi %5, %8 : i32
    %10 = vector.broadcast %9 : i32 to vector<8x128xi32>
    %11 = arith.addi %6, %10 : vector<8x128xi32>
    %c1_i32_3 = arith.constant 1 : i32
    %12 = vector.broadcast %c1_i32_3 : i32 to vector<8x128xi32>
    %13 = arith.cmpi slt, %11, %12 : vector<8x128xi32>
    %14 = arith.index_cast %8 : i32 to index
    %c0 = arith.constant 0 : index
    %15 = vector.load %arg2[%14, %c0] : memref<8x128xf32, #tpu.memory_space<vmem>>, vector<8x128xf32>
    %cst = arith.constant 0.000000e+00 : f32
    %16 = vector.broadcast %cst : f32 to vector<8x128xf32>
    %17 = arith.select %13, %15, %16 : vector<8x128xi1>, vector<8x128xf32>
    %c1_i32_4 = arith.constant 1 : i32
    %18 = vector.broadcast %c1_i32_4 : i32 to vector<8x128xi32>
    %19 = arith.cmpi slt, %11, %18 : vector<8x128xi32>
    %20 = arith.index_cast %8 : i32 to index
    %c0_5 = arith.constant 0 : index
    %21 = vector.load %arg3[%20, %c0_5] : memref<8x128xf32, #tpu.memory_space<vmem>>, vector<8x128xf32>
    %cst_6 = arith.constant 0.000000e+00 : f32
    %22 = vector.broadcast %cst_6 : f32 to vector<8x128xf32>
    %23 = arith.select %19, %21, %22 : vector<8x128xi1>, vector<8x128xf32>
    %c0_7 = arith.constant 0 : index
    %c0_8 = arith.constant 0 : index
    %24 = vector.load %arg6[%c0_7, %c0_8] : memref<8x128xf32, #tpu.memory_space<vmem>>, vector<8x128xf32>
    %25 = arith.addf %17, %23 : vector<8x128xf32>
    %26 = vector.shape_cast %25 : vector<8x128xf32> to vector<1x8x128xf32>
    %cst_9 = arith.constant dense<0.000000e+00> : vector<8x128xf32>
    %27 = vector.multi_reduction <add>, %26, %cst_9 [0] : vector<1x8x128xf32> to vector<8x128xf32>
    %28 = arith.addf %24, %27 : vector<8x128xf32>
    %c0_10 = arith.constant 0 : index
    %c0_11 = arith.constant 0 : index
    %29 = vector.load %arg6[%c0_10, %c0_11] : memref<8x128xf32, #tpu.memory_space<vmem>>, vector<8x128xf32>
    tpu.vector_store %arg6[%c0_10, %c0_11], %28 {strides = array<i32>} : memref<8x128xf32, #tpu.memory_space<vmem>>, vector<8x128xf32>,
    %c0_12 = arith.constant 0 : index
    %c0_13 = arith.constant 0 : index
    %30 = vector.load %arg7[%c0_12, %c0_13] : memref<8x128xf32, #tpu.memory_space<vmem>>, vector<8x128xf32>
    %31 = arith.mulf %17, %17 : vector<8x128xf32>
    %32 = arith.mulf %23, %23 : vector<8x128xf32>
    %33 = arith.addf %31, %32 : vector<8x128xf32>
    %34 = vector.shape_cast %33 : vector<8x128xf32> to vector<1x8x128xf32>
    %cst_14 = arith.constant dense<0.000000e+00> : vector<8x128xf32>
    %35 = vector.multi_reduction <add>, %34, %cst_14 [0] : vector<1x8x128xf32> to vector<8x128xf32>
    %36 = arith.addf %30, %35 : vector<8x128xf32>
    %c0_15 = arith.constant 0 : index
    %c0_16 = arith.constant 0 : index
    %37 = vector.load %arg7[%c0_15, %c0_16] : memref<8x128xf32, #tpu.memory_space<vmem>>, vector<8x128xf32>
    tpu.vector_store %arg7[%c0_15, %c0_16], %36 {strides = array<i32>} : memref<8x128xf32, #tpu.memory_space<vmem>>, vector<8x128xf32>,
    %c1_i32_17 = arith.constant 1 : i32
    %c0_i32_18 = arith.constant 0 : i32
    %38 = arith.cmpi eq, %arg1, %c0_i32_18 : i32
    %39 = arith.extui %38 : i1 to i32
    %c0_i32_19 = arith.constant 0 : i32
    %40 = arith.cmpi ne, %39, %c0_i32_19 : i32
    scf.if %40 {
      %cst_20 = arith.constant 0.000000e+00 : f32
      %41 = vector.broadcast %cst_20 : f32 to vector<1x8x128xf32>
      %c0_21 = arith.constant 0 : index
      %c0_22 = arith.constant 0 : index
      %42 = vector.load %arg6[%c0_21, %c0_22] : memref<8x128xf32, #tpu.memory_space<vmem>>, vector<8x128xf32>
      %43 = vector.shape_cast %42 : vector<8x128xf32> to vector<1x8x128xf32>
      %cst_23 = arith.constant dense<0.000000e+00> : vector<1xf32>
      %44 = vector.multi_reduction <add>, %43, %cst_23 [1, 2] : vector<1x8x128xf32> to vector<1xf32>
      %45 = vector.shape_cast %44 : vector<1xf32> to vector<1x1x1xf32>
      %46 = vector.extract %45[0, 0, 0] : f32 from vector<1x1x1xf32>
      %47 = vector.broadcast %46 : f32 to vector<1x8x128xf32>
      %48 = arith.addf %41, %47 : vector<1x8x128xf32>
      %c0_24 = arith.constant 0 : index
      %c0_25 = arith.constant 0 : index
      %c0_26 = arith.constant 0 : index
      %49 = vector.load %arg4[%c0_24, %c0_25, %c0_26] : memref<1x8x128xf32, #tpu.memory_space<vmem>>, vector<1x8x128xf32>
      tpu.vector_store %arg4[%c0_24, %c0_25, %c0_26], %48 {strides = array<i32>} : memref<1x8x128xf32, #tpu.memory_space<vmem>>, vector<1x8x128xf32>,
      %cst_27 = arith.constant 0.000000e+00 : f32
      %50 = vector.broadcast %cst_27 : f32 to vector<1x8x128xf32>
      %c0_28 = arith.constant 0 : index
      %c0_29 = arith.constant 0 : index
      %51 = vector.load %arg7[%c0_28, %c0_29] : memref<8x128xf32, #tpu.memory_space<vmem>>, vector<8x128xf32>
      %52 = vector.shape_cast %51 : vector<8x128xf32> to vector<1x8x128xf32>
      %cst_30 = arith.constant dense<0.000000e+00> : vector<1xf32>
      %53 = vector.multi_reduction <add>, %52, %cst_30 [1, 2] : vector<1x8x128xf32> to vector<1xf32>
      %54 = vector.shape_cast %53 : vector<1xf32> to vector<1x1x1xf32>
      %55 = vector.extract %54[0, 0, 0] : f32 from vector<1x1x1xf32>
      %56 = vector.broadcast %55 : f32 to vector<1x8x128xf32>
      %57 = arith.addf %50, %56 : vector<1x8x128xf32>
      %c0_31 = arith.constant 0 : index
      %c0_32 = arith.constant 0 : index
      %c0_33 = arith.constant 0 : index
      %58 = vector.load %arg5[%c0_31, %c0_32, %c0_33] : memref<1x8x128xf32, #tpu.memory_space<vmem>>, vector<1x8x128xf32>
      tpu.vector_store %arg5[%c0_31, %c0_32, %c0_33], %57 {strides = array<i32>} : memref<1x8x128xf32, #tpu.memory_space<vmem>>, vector<1x8x128xf32>,
    } else {
    }
    return
  }
  func.func @transform_0(%arg0: i32, %arg1: i32) -> (i32, i32) {
    %c1_i32 = arith.constant 1 : i32
    %0 = arith.muli %arg0, %c1_i32 : i32
    %1 = arith.addi %0, %arg1 : i32
    %c0_i32 = arith.constant 0 : i32
    %2 = arith.minsi %1, %c0_i32 : i32
    %c0_i32_0 = arith.constant 0 : i32
    %c0_i32_1 = arith.constant 0 : i32
    return %2, %c0_i32_0 : i32, i32
  }
  func.func @transform_1(%arg0: i32, %arg1: i32) -> (i32, i32) {
    %c1_i32 = arith.constant 1 : i32
    %0 = arith.muli %arg0, %c1_i32 : i32
    %1 = arith.addi %0, %arg1 : i32
    %c0_i32 = arith.constant 0 : i32
    %2 = arith.minsi %1, %c0_i32 : i32
    %c0_i32_0 = arith.constant 0 : i32
    %c0_i32_1 = arith.constant 0 : i32
    return %2, %c0_i32_0 : i32, i32
  }
  func.func @transform_2(%arg0: i32, %arg1: i32) -> (i32, i32, i32) {
    %c0_i32 = arith.constant 0 : i32
    %c0_i32_0 = arith.constant 0 : i32
    %c0_i32_1 = arith.constant 0 : i32
    return %arg0, %c0_i32, %c0_i32_0 : i32, i32, i32
  }
  func.func @transform_3(%arg0: i32, %arg1: i32) -> (i32, i32, i32) {
    %c0_i32 = arith.constant 0 : i32
    %c0_i32_0 = arith.constant 0 : i32
    %c0_i32_1 = arith.constant 0 : i32
    return %arg0, %c0_i32, %c0_i32_0 : i32, i32, i32
  }
}

</mosaic_0001>

<bundles_post_ra>
// kernel: tpu_custom_call.1
= control target key start
LH: loop header
LB: loop body
LE: loop exit
PB: predicated region body
PF: predicated region fallthrough
CT: control target
= control target key end

     0   :  { %s1049_s0 = inlined_call_operand.hbm [shape: f32[1,128], index: 0, kind: input, shape index: {}]   ;;  %s1050_s1 = inlined_call_operand.hbm [shape: f32[1,128], index: 1, kind: input, shape index: {}]   ;;  %s1051_s2 = inlined_call_operand.hbm [shape: f32[2,8,128], index: 2, kind: output, shape index: {0}]   ;;  %s1052_s3 = inlined_call_operand.hbm [shape: f32[2,8,128], index: 3, kind: output, shape index: {1}]  }
   0x1   :  { %1053 = sst [smem:[#allocation16_spill]] %s1049_s0 }
   0x2   :  { %9 = vsyncpa [#allocation5], 0 }
   0x3   :  { %11 = vsyncpa [#allocation5 + $0x1], 0 }
   0x4   :  { %12 = vsyncpa [#allocation8], 0 }
   0x5   :  { %14 = vsyncpa [#allocation8 + $0x1], 0 }
   0x6   :  { %15 = vsyncpa [#allocation6], 0 }
   0x7   :  { %17 = vsyncpa [#allocation6 + $0x1], 0 }
   0x8   :  { %18 = vsyncpa [#allocation11], 0 }
   0x9   :  { %20 = vsyncpa [#allocation11 + $0x1], 0  ;;  %s881_s12 = smov 0   ;;  %s883_s13 = smov 0  }
   0xa   :  { %s885_s14 = smov 0   ;;  %s887_s15 = smov 0  }
   0xb   :  { %s889_s16 = smov 0   ;;  %s891_s17 = smov 0  }
   0xc   :  { %s893_s18 = smov 0   ;;  %s895_s19 = smov 0  }
   0xd LB: > { %s516_s20 = sadd.s32 4294967295, %s853_s19   ;;  %s517_s21 = sadd.s32 4294967294, %s853_s19   ;;  %s853_s19 = sphi %s895_s19, %s26_s19   ;;  %s849_s18 = sphi %s893_s18, %s1064_s18   ;;  %s845_s17 = sphi %s891_s17, %s1063_s17   ;;  %s841_s16 = sphi %s889_s16, %s1039_s16   ;;  %s837_s15 = sphi %s887_s15, %s1062_s15   ;;  %s833_s14 = sphi %s885_s14, %s1061_s14   ;;  %s829_s13 = sphi %s883_s13, %s1060_s13   ;;  %s825_s12 = sphi %s881_s12, %s1059_s12  }
   0xe   : > { %s38_s22 = sadd.s32 1, %s849_s18  ;;  %p822_p1 = scmp.ne.s32.totalorder %s841_s16, 0 }
   0xf   : > { %p40_p0 = scmp.ge.s32.totalorder %s38_s22, 2  ;;  %p59_p2 = scmp.eq.s32.totalorder %s853_s19, 0 }
  0x10   : > { %p64_p3 = scmp.ne.s32.totalorder %s841_s16, %s837_s15  ;;  %p65_p5 = scmp.eq.s32.totalorder %s516_s20, 0 }
  0x11   : > { %s1066_s22 = smov (%p40_p0, %s38_s22), 0  ;;  %p927_p4 = por %p822_p1, %p59_p2 }
  0x12   : > { %p931_p6 = por %p65_p5, %p64_p3  ;;  %s106_s25 = ssub.s32 %s849_s18, %s1066_s22 }
  0x13   : > { %p107_p7 = scmp.eq.s32.totalorder %s106_s25, 0  ;;  %s109_s26 = sadd.s32 1, %s833_s14 }
  0x14   : > { %p119_p8 = scmp.ne.s32.totalorder %s833_s14, %s829_s13  ;;  %p120_p9 = scmp.eq.s32.totalorder %s516_s20, 1 }
  0x15   : > { %s939_s27 = scalar_select %p107_p7, %s833_s14, %s109_s26  }
  0x16   : > { %p125_p10 = scmp.ne.s32.totalorder %s829_s13, %s825_s12  ;;  %p126_p11 = scmp.eq.s32.totalorder %s517_s21, 1 }
  0x17   : > { %p945_p12 = por %p120_p9, %p119_p8  ;;  %p519_p0 = scmp.ge.s32.totalorder %s853_s19, 2 }
  0x18   : > { %p949_p13 = por %p126_p11, %p125_p10 }
  0x19   : > { %168 = sbr.rel (%p519_p0) target bundleno = 80 (0x50), region = 16 }
  0x1e   : > { %171 = sbr.rel (!%p927_p4) target bundleno = 58 (0x3a), region = 20 }
  0x23   : > { %184 = vsyncadd [#allocation5], 112  ;;  %s1058_s0 = sld [smem:[#allocation16_spill]]  ;;  %s855_s6 = smov [#allocation4]  }
  0x24   : > { %s189_s7 = sshll.u32 %s855_s6, 4  ;;  %s190_s7 = int_to_ptr.vmem [resolvable:$true] %s189_s7 }
  0x29   : > { %s187_s5 = sshll.u32 %s1058_s0, 4  ;;  %s643_s15 = scalar_lea.hbm %s1058_s0, 1  ;;  %s188_s5 = int_to_ptr.hbm [resolvable:$true] %s187_s5 }
  0x2a   : > { %s632_s8 = sshra.s32 %s188_s5, 4  ;;  %s633_s8 = int_to_ptr.hbm [resolvable:$true] %s632_s8 }
  0x2b   : > { %s639_s9 = scalar_lea.hbm %s633_s8, 1 }
  0x2c   : > { %p640_p1 = scmp.ne.s32.totalorder %s633_s8, %s639_s9  ;;  %p645_p2 = scmp.lt.s32.totalorder %s643_s15, %s639_s9 }
  0x2e   : > { %p647_p3 = pnand %p645_p2, %p640_p1 }
  0x30   : > { %650 = shalt.err (!%p647_p3)
}
  0x31   : > { %s651_s20 = sshra.s32 %s190_s7, 4  ;;  %s662_s25 = scalar_lea.vmem %s855_s6, 16  ;;  %s652_s20 = int_to_ptr.vmem [resolvable:$true] %s651_s20 }
  0x32   : > { %s658_s21 = scalar_lea.vmem %s652_s20, 1 }
  0x33   : > { %p659_p5 = scmp.ne.s32.totalorder %s652_s20, %s658_s21  ;;  %p664_p7 = scmp.lt.s32.totalorder %s662_s25, %s658_s21 }
  0x35   : > { %p666_p8 = pnand %p664_p7, %p659_p5 }
  0x37   : > { %669 = shalt.err (!%p666_p8)
}
  0x38   : > { %s856_s26 = smov 16   ;;  %s857_s30 = smov 1  }
  0x39   : > { %195 = dma.hbm_to_vmem [thread:$0]  %s188_s5, 16, %s190_s7, [#allocation5], %s856_s26, %s856_s26, %s857_s30  }
  0x3a PF: > { %198 = sbr.rel (!%p927_p4) target bundleno = 80 (0x50), region = 24 }
  0x3f   : > { %211 = vsyncadd [#allocation8], 112  ;;  %s214_s9 = sshll.u32 %s1050_s1, 4  ;;  %s858_s10 = smov [#allocation7]   ;;  %s215_s9 = int_to_ptr.hbm [resolvable:$true] %s214_s9 }
  0x40   : > { %s216_s11 = sshll.u32 %s858_s10, 4  ;;  %s671_s6 = sshra.s32 %s215_s9, 4  ;;  %s217_s11 = int_to_ptr.vmem [resolvable:$true] %s216_s11  ;;  %s672_s6 = int_to_ptr.hbm [resolvable:$true] %s671_s6 }
  0x41   : > { %s678_s15 = scalar_lea.hbm %s672_s6, 1  ;;  %s682_s5 = scalar_lea.hbm %s1050_s1, 1 }
  0x42   : > { %p679_p9 = scmp.ne.s32.totalorder %s672_s6, %s678_s15  ;;  %p684_p10 = scmp.lt.s32.totalorder %s682_s5, %s678_s15 }
  0x44   : > { %p686_p11 = pnand %p684_p10, %p679_p9 }
  0x46   : > { %689 = shalt.err (!%p686_p11)
}
  0x47   : > { %s690_s23 = sshra.s32 %s217_s11, 4  ;;  %s701_s25 = scalar_lea.vmem %s858_s10, 16  ;;  %s691_s23 = int_to_ptr.vmem [resolvable:$true] %s690_s23 }
  0x48   : > { %s697_s7 = scalar_lea.vmem %s691_s23, 1 }
  0x49   : > { %p698_p4 = scmp.ne.s32.totalorder %s691_s23, %s697_s7  ;;  %p703_p1 = scmp.lt.s32.totalorder %s701_s25, %s697_s7 }
  0x4b   : > { %p705_p2 = pnand %p703_p1, %p698_p4 }
  0x4d   : > { %708 = shalt.err (!%p705_p2)
}
  0x4e   : > { %s859_s26 = smov 16   ;;  %s860_s30 = smov 1  }
  0x4f   : > { %222 = dma.hbm_to_vmem [thread:$0]  %s215_s9, 16, %s217_s11, [#allocation8], %s859_s26, %s859_s26, %s860_s30  }
  0x50 PF: > { %p526_p3 = scmp.ge.s32.totalorder %s853_s19, 1  ;;  %p224_p5 = scmp.lt.s32.totalorder %s853_s19, 3 }
  0x52   : > { %p225_p7 = pnand %p526_p3, %p224_p5 }
  0x53   : > { %s230_s4 = sand.u32 (!%p225_p7), 1, %s841_s16  }
  0x54   : > { %228 = sbr.rel (%p225_p7) target bundleno = 298 (0x12a), region = 28  ;;  %s527_s8 = sshll.u32 (!%p225_p7), %s230_s4, 3 }
  0x55   : > { %s231_s6 = scalar_lea.sflag (!%p225_p7), [#allocation5], %s230_s4  ;;  %s234_s10 = scalar_lea.vmem (!%p225_p7), [#allocation4], %s527_s8 }
  0x59   : > { %803 = dma.done.wait (%p931_p6), %s231_s6, 128  }
  0x5a   : > { %805 = vsyncadd (%p931_p6), %s231_s6, 4294967168  ;;  %s241_s9 = scalar_lea.sflag [#allocation8], %s230_s4  ;;  %s244_s11 = scalar_lea.vmem [#allocation7], %s527_s8 }
  0x5b   : > { %807 = dma.done.wait (%p931_p6), %s241_s9, 128  }
  0x5c   : > { %809 = vsyncadd (%p931_p6), %s241_s9, 4294967168  ;;  %s984_s15 = sshll.u32 %s845_s17, 3  ;;  %v296_v0 = vlaneseq  ;;  %v302_v4 = vld [vmem:[%s234_s10] sm:$0xff]  ;;  %v304_v5 = vld [vmem:[%s244_s11] sm:$0xff]  ;;  %s988_s17 = sand.u32 1, %s829_s13  }
  0x5d   : > { %v299_v1 = vstv %s984_s15  ;;  %s529_s24 = sshll.u32 %s988_s17, 3  ;;  %s363_s5 = scalar_lea.hbm %s1051_s2, %s984_s15 }
  0x5e   : > { %v297_v2 = vshrl.u32 %v296_v0, 7  ;;  %s270_s23 = scalar_lea.vmem [#allocation9], %s529_s24  ;;  %s367_s25 = sshll.u32 %s363_s5, 4  ;;  %s368_s25 = int_to_ptr.hbm [resolvable:$true] %s367_s25 }
  0x5f   : > { %s365_s7 = sshll.u32 %s270_s23, 4  ;;  %s377_s8 = scalar_lea.hbm %s1052_s3, %s984_s15  ;;  %s366_s7 = int_to_ptr.vmem [resolvable:$true] %s365_s7 }
  0x60   : > { %v300_v3 = vadd.s32 %v299_v1, %v297_v2  ;;  %s348_s6 = scalar_lea.sflag [#allocation6], %s988_s17  ;;  %s724_s10 = sshra.s32 %s368_s25, 4  ;;  %s725_s10 = int_to_ptr.hbm [resolvable:$true] %s724_s10 }
  0x61   : > { %s726_s9 = scalar_lea.hbm %s725_s10, 8  ;;  %s730_s21 = scalar_lea.hbm %s1051_s2, 16 }
  0x62   : > { %vm301_vm0 = vcmp.lt.s32.totalorder %v300_v3, 1  ;;  %p727_p6 = scmp.ne.s32.totalorder %s725_s10, %s726_s9  ;;  %p731_p10 = scmp.lt.s32.totalorder %s725_s10, %s1051_s2 }
  0x63   : > { %v303_v6 = vsel %vm301_vm0, %v302_v4, 0.0  ;;  %v305_v7 = vsel %vm301_vm0, %v304_v5, 0.0  ;;  %p732_p11 = scmp.lt.s32.totalorder %s730_s21, %s726_s9 }
  0x64   : > { %v307_v8 = vadd.f32 %v305_v7, %v303_v6  ;;  %v312_v9 = vmul.f32 %v303_v6, %v303_v6  ;;  %v313_v10 = vmul.f32 %v305_v7, %v305_v7  ;;  %p728_p8 = pnand %p727_p6, %p945_p12 }
  0x65   : > { %p733_p4 = por %p732_p11, %p731_p10 }
  0x66   : > { %322 = vadd.xlane.f32.xlu0 %v307_v8  ;;  %v314_v11 = vadd.f32 %v313_v10, %v312_v9  ;;  %p729_p9 = pneg %p728_p8 }
  0x68   : > { %p734_p1 = pnand %p733_p4, %p729_p9 }
  0x6e   : > { %335 = vadd.xlane.f32.xlu0 %v314_v11 }
  0xd9   : > { %v323_v12 = vpop.xlane.xlu0 %322 }
  0xda   : > { %v324_v13 = vrot.slane %v323_v12, 4 }
  0xdc   : > { %v325_v14 = vadd.f32 %v324_v13, %v323_v12 }
  0xde   : > { %v326_v15 = vrot.slane %v325_v14, 2 }
  0xe0   : > { %v327_v16 = vadd.f32 %v326_v15, %v325_v14 }
  0xe1   : > { %v336_v17 = vpop.xlane.xlu0 %335 }
  0xe2   : > { %v337_v18 = vrot.slane %v336_v17, 4  ;;  %v328_v19 = vrot.slane %v327_v16, 1 }
  0xe4   : > { %v338_v20 = vadd.f32 %v337_v18, %v336_v17  ;;  %v329_v21 = vadd.f32 %v328_v19, %v327_v16 }
  0xe6   : > { %v339_v22 = vrot.slane %v338_v20, 2  ;;  %538 = vpush %v329_v21 }
  0xe8   : > { %v340_v23 = vadd.f32 %v339_v22, %v338_v20 }
  0xea   : > { %v341_v24 = vrot.slane %v340_v23, 1 }
  0xec   : > { %v342_v25 = vadd.f32 %v341_v24, %v340_v23 }
  0xee   : > { %540 = vpush %v342_v25 }
 0x117   : > { %s539_s26 = spop %538 }
 0x118   : > { %v331_v26 = vstv %s539_s26 }
 0x119   : > { %333 = vst [vmem:[%s270_s23] sm:$0xff] %v331_v26 }
 0x11a   : > { %737 = shalt.err (!%p734_p1)
}
 0x11b   : > { %544 = dma.vmem_to_hbm [thread:$0]  (%p945_p12), %s366_s7, 128, %s368_s25, %s348_s6  }
 0x11c   : > { %s277_s15 = scalar_lea.vmem [#allocation10], %s529_s24  ;;  %s381_s26 = sshll.u32 %s377_s8, 4  ;;  %s382_s26 = int_to_ptr.hbm [resolvable:$true] %s381_s26 }
 0x11d   : > { %s379_s23 = sshll.u32 %s277_s15, 4  ;;  %s353_s4 = scalar_lea.sflag [#allocation11], %s988_s17  ;;  %s380_s23 = int_to_ptr.vmem [resolvable:$true] %s379_s23 }
 0x11e   : > { %s752_s0 = sshra.s32 %s382_s26, 4  ;;  %s758_s7 = scalar_lea.hbm %s1052_s3, 16  ;;  %s753_s0 = int_to_ptr.hbm [resolvable:$true] %s752_s0 }
 0x11f   : > { %s541_s30 = spop %540  ;;  %s754_s10 = scalar_lea.hbm %s753_s0, 8 }
 0x120   : > { %v344_v27 = vstv %s541_s30  ;;  %p755_p2 = scmp.ne.s32.totalorder %s753_s0, %s754_s10  ;;  %p759_p7 = scmp.lt.s32.totalorder %s753_s0, %s1052_s3 }
 0x121   : > { %346 = vst [vmem:[%s277_s15] sm:$0xff] %v344_v27  ;;  %p760_p6 = scmp.lt.s32.totalorder %s758_s7, %s754_s10 }
 0x122   : > { %p756_p3 = pnand %p755_p2, %p945_p12 }
 0x123   : > { %p761_p8 = por %p760_p6, %p759_p7 }
 0x124   : > { %p757_p5 = pneg %p756_p3 }
 0x126   : > { %p762_p9 = pnand %p761_p8, %p757_p5 }
 0x128   : > { %765 = shalt.err (!%p762_p9)
}
 0x129   : > { %545 = dma.vmem_to_hbm [thread:$0]  (%p945_p12), %s380_s23, 128, %s382_s26, %s353_s4  }
 0x12a PF: > { %s393_s17 = sand.u32 1, %s825_s12   ;;  %p549_p10 = pnand %p519_p0, %p949_p13 }
 0x12b   : > { %s394_s8 = scalar_lea.sflag [#allocation6], %s393_s17 }
 0x12c   : > { %p550_p11 = pneg %p549_p10 }
 0x12e   : > { %811 = dma.done.wait (%p550_p11), %s394_s8, 128  }
 0x12f   : > { %813 = vsyncadd (%p550_p11), %s394_s8, 4294967168  ;;  %s404_s6 = scalar_lea.sflag [#allocation11], %s393_s17 }
 0x130   : > { %815 = dma.done.wait (%p550_p11), %s404_s6, 128  }
 0x131   : > { %817 = vsyncadd (%p550_p11), %s404_s6, 4294967168  ;;  %s26_s19 = sadd.s32 1, %s853_s19   ;;  %s1059_s12 = smov %s829_s13 }
 0x132   : > { %p23_p4 = scmp.ge.s32.totalorder %s26_s19, 4   ;;  %s1060_s13 = smov %s833_s14 }
 0x133   : > { %s1061_s14 = smov %s939_s27  ;;  %s1062_s15 = smov %s841_s16 }
 0x134   : > { %s1039_s16 = smov 0   ;;  %s1063_s17 = smov %s849_s18 }
 0x135   : > { %s1064_s18 = smov %s1066_s22  ;;  %25 = sbr.rel (!%p23_p4) target bundleno = 13 (0xd), region = 111 }
 0x13a   :  { %410 = vsyncpa [#allocation5], 1 }
 0x13b   :  { %412 = vsyncpa [#allocation5 + $0x1], 1 }
 0x13c   :  { %413 = vsyncpa [#allocation8], 1 }
 0x13d   :  { %415 = vsyncpa [#allocation8 + $0x1], 1 }
 0x13e   :  { %416 = vsyncpa [#allocation6], 1 }
 0x13f   :  { %418 = vsyncpa [#allocation6 + $0x1], 1 }
 0x140   :  { %419 = vsyncpa [#allocation11], 1 }
 0x141   :  { %421 = vsyncpa [#allocation11 + $0x1], 1 }

</bundles_post_ra>
